<compile_context>
chip_gen: v7x
topology: tpu7x:2x2x1
jax: 0.10.0
libtpu: 0.0.40
codegen_flags: <defaults>
</compile_context>

<pallas_src>
import math

import jax
import jax.numpy as jnp
from jax.experimental import pallas as pl
from jax.experimental.pallas import tpu as pltpu


def _add_kernel(a_ref, b_ref, o_ref):
    # Single whole-tile elementwise add on the VPU.
    o_ref[...] = a_ref[...] + b_ref[...]


def pallas_add(x126, x133):
    assert x126.shape == x133.shape
    assert x126.dtype == x133.dtype
    orig_shape = x126.shape

    # Flatten leading dims so the channel axis (384 = 3*128) is lane-dense.
    rows = math.prod(orig_shape[:-1])
    cols = orig_shape[-1]
    a2 = x126.reshape(rows, cols)
    b2 = x133.reshape(rows, cols)

    vmem_spec = pl.BlockSpec(memory_space=pltpu.MemorySpace.VMEM)
    out = pl.pallas_call(
        _add_kernel,
        out_shape=jax.ShapeDtypeStruct((rows, cols), x126.dtype),
        in_specs=[vmem_spec, vmem_spec],
        out_specs=vmem_spec,
        # Residual-add pattern: reuse input 0's buffer for the output.
        input_output_aliases={0: 0},
    )(a2, b2)
    return out.reshape(orig_shape)


if __name__ == "__main__":
    key = jax.random.PRNGKey(0)
    k1, k2 = jax.random.split(key)
    # Shapes match the PyTorch module: torch.Size([1, 14, 14, 384]), float32.
    x126 = jax.random.normal(k1, (1, 14, 14, 384), dtype=jnp.float32)
    x133 = jax.random.normal(k2, (1, 14, 14, 384), dtype=jnp.float32)

    # Reference computed first (defensive w.r.t. output/input aliasing).
    ref = x126 + x133

    out = pallas_add(x126, x133)
    out = jax.block_until_ready(out)

    assert out.shape == ref.shape
    assert out.dtype == ref.dtype
    assert jnp.allclose(out, ref, atol=1e-6, rtol=1e-6)
    print("KERNEL_OK")
</pallas_src>

<mosaic_0001>
module attributes {stable_mosaic.version = 11 : i64} {
  func.func @_add_kernel(%arg0: memref<196x384xf32, #tpu.memory_space<vmem>>, %arg1: memref<196x384xf32, #tpu.memory_space<vmem>>, %arg2: memref<196x384xf32, #tpu.memory_space<vmem>>) attributes {dimension_semantics = [], scalar_prefetch = 0 : i64, scratch_operands = 0 : i64, tpu.core_type = #tpu.core_type<tc>} {
    %c0 = arith.constant 0 : index
    %c0_0 = arith.constant 0 : index
    %0 = vector.load %arg0[%c0, %c0_0] : memref<196x384xf32, #tpu.memory_space<vmem>>, vector<196x384xf32>
    %c0_1 = arith.constant 0 : index
    %c0_2 = arith.constant 0 : index
    %1 = vector.load %arg1[%c0_1, %c0_2] : memref<196x384xf32, #tpu.memory_space<vmem>>, vector<196x384xf32>
    %2 = arith.addf %0, %1 : vector<196x384xf32>
    %c0_3 = arith.constant 0 : index
    %c0_4 = arith.constant 0 : index
    %3 = vector.load %arg2[%c0_3, %c0_4] : memref<196x384xf32, #tpu.memory_space<vmem>>, vector<196x384xf32>
    tpu.vector_store %arg2[%c0_3, %c0_4], %2 {strides = array<i32>} : memref<196x384xf32, #tpu.memory_space<vmem>>, vector<196x384xf32>,
    return
  }
}

</mosaic_0001>

<bundles_post_ra>
// kernel: tpu_custom_call.1
= control target key start
LH: loop header
LB: loop body
LE: loop exit
PB: predicated region body
PF: predicated region fallthrough
CT: control target
= control target key end

     0   :  { %7 = vsyncpa [#allocation3], 0  ;;  %s669_s0 = inlined_call_operand.hbm [shape: f32[196,384], index: 0, kind: input, shape index: {}, may-alias: {0,2}]   ;;  %s670_s1 = inlined_call_operand.vmem [shape: f32[196,384], index: 1, kind: input, shape index: {}]   ;;  %s671_s2 = inlined_call_operand.hbm [shape: f32[196,384], index: 2, kind: output, shape index: {}, may-alias: {0,2}]  }
   0x1   :  { %8 = vsyncpa [#allocation4], 0  ;;  %s395_s9 = smov [#allocation2]   ;;  %s347_s13 = scalar_lea.hbm %s669_s0, 9600 }
   0x2   :  { %s14_s10 = sshll.u32 %s395_s9, 4  ;;  %p348_p0 = scmp.ne.s32.totalorder %s669_s0, %s347_s13  ;;  %s15_s10 = int_to_ptr.vmem [resolvable:$true] %s14_s10 }
   0x3   :  { %p351_p1 = scmp.lt.u32.totalorder %s347_s13, %s669_s0 }
   0x5   :  { %p353_p2 = pnand %p351_p1, %p348_p0 }
   0x7   :  { %356 = shalt.err (!%p353_p2)
}
   0x8   :  { %s357_s18 = scalar_lea.vmem %s15_s10, 9600  ;;  %p362_p4 = scmp.lt.s32.totalorder %s15_s10, %s15_s10 }
   0x9   :  { %p358_p3 = scmp.ne.s32.totalorder %s15_s10, %s357_s18  ;;  %p363_p5 = scmp.lt.s32.totalorder %s357_s18, %s357_s18 }
   0xb   :  { %p364_p6 = por %p363_p5, %p362_p4 }
   0xd   :  { %p365_p7 = pnand %p364_p6, %p358_p3 }
   0xf   :  { %368 = shalt.err (!%p365_p7)
}
  0x10   :  { %s396_s19 = smov 384   ;;  %s397_s20 = smov 24  }
  0x11   :  { %20 = dma.hbm_to_vmem [thread:$0]  %s669_s0, 9600, %s15_s10, [#allocation3], %s396_s19, %s396_s19, %s397_s20  }
  0x12   :  { %391 = dma.done.wait [#allocation3], 9600  }
  0x13   :  { %392 = vsyncadd [#allocation3], 4294957696  ;;  %v26_v0 = vld [vmem:[#allocation2] sm:$0xff]  ;;  %v27_v2 = vld [vmem:[#allocation2 + $0x8] sm:$0xff]  ;;  %s398_s3 = smov [#allocation5]  }
  0x14   :  { %v101_v1 = vld [vmem:[%s670_s1] sm:$0xff]  ;;  %v102_v4 = vld [vmem:[%s670_s1 + $0x8] sm:$0xff]  ;;  %v28_v5 = vld [vmem:[#allocation2 + $0x10] sm:$0xff]  ;;  %s331_s4 = sshll.u32 %s398_s3, 4  ;;  %s332_s4 = int_to_ptr.vmem [resolvable:$true] %s331_s4 }
  0x15   :  { %v176_v3 = vadd.f32 %v101_v1, %v26_v0  ;;  %v103_v6 = vld [vmem:[%s670_s1 + $0x10] sm:$0xff]  ;;  %v177_v7 = vadd.f32 %v102_v4, %v27_v2  ;;  %v29_v9 = vld [vmem:[#allocation2 + $0x18] sm:$0xff]  ;;  %v30_v11 = vld [vmem:[#allocation2 + $0x20] sm:$0xff]  ;;  %s369_s11 = scalar_lea.vmem %s332_s4, 9600  ;;  %p374_p9 = scmp.lt.s32.totalorder %s332_s4, %s332_s4 }
  0x16   :  { %v178_v8 = vadd.f32 %v103_v6, %v28_v5  ;;  %v104_v10 = vld [vmem:[%s670_s1 + $0x18] sm:$0xff]  ;;  %v105_v13 = vld [vmem:[%s670_s1 + $0x20] sm:$0xff]  ;;  %v31_v14 = vld [vmem:[#allocation2 + $0x28] sm:$0xff]  ;;  %p370_p8 = scmp.ne.s32.totalorder %s332_s4, %s369_s11  ;;  %p375_p10 = scmp.lt.s32.totalorder %s369_s11, %s369_s11 }
  0x17   :  { %251 = vst [vmem:[#allocation5] sm:$0xff] %v176_v3  ;;  %v179_v12 = vadd.f32 %v104_v10, %v29_v9  ;;  %v106_v15 = vld [vmem:[%s670_s1 + $0x28] sm:$0xff]  ;;  %252 = vst [vmem:[#allocation5 + $0x8] sm:$0xff] %v177_v7  ;;  %v180_v16 = vadd.f32 %v105_v13, %v30_v11  ;;  %v32_v18 = vld [vmem:[#allocation2 + $0x30] sm:$0xff] }
  0x18   :  { %253 = vst [vmem:[#allocation5 + $0x10] sm:$0xff] %v178_v8  ;;  %v181_v17 = vadd.f32 %v106_v15, %v31_v14  ;;  %v107_v19 = vld [vmem:[%s670_s1 + $0x30] sm:$0xff]  ;;  %v33_v20 = vld [vmem:[#allocation2 + $0x38] sm:$0xff]  ;;  %v34_v23 = vld [vmem:[#allocation2 + $0x40] sm:$0xff]  ;;  %p376_p11 = por %p375_p10, %p374_p9 }
  0x19   :  { %254 = vst [vmem:[#allocation5 + $0x18] sm:$0xff] %v179_v12  ;;  %v182_v21 = vadd.f32 %v107_v19, %v32_v18  ;;  %v108_v22 = vld [vmem:[%s670_s1 + $0x38] sm:$0xff]  ;;  %v109_v24 = vld [vmem:[%s670_s1 + $0x40] sm:$0xff]  ;;  %255 = vst [vmem:[#allocation5 + $0x20] sm:$0xff] %v180_v16 }
  0x1a   :  { %256 = vst [vmem:[#allocation5 + $0x28] sm:$0xff] %v181_v17  ;;  %v183_v25 = vadd.f32 %v108_v22, %v33_v20  ;;  %v184_v26 = vadd.f32 %v109_v24, %v34_v23  ;;  %v35_v27 = vld [vmem:[#allocation2 + $0x48] sm:$0xff]  ;;  %v36_v29 = vld [vmem:[#allocation2 + $0x50] sm:$0xff]  ;;  %v37_v32 = vld [vmem:[#allocation2 + $0x58] sm:$0xff]  ;;  %p377_p12 = pnand %p376_p11, %p370_p8 }
  0x1b   :  { %v110_v28 = vld [vmem:[%s670_s1 + $0x48] sm:$0xff]  ;;  %257 = vst [vmem:[#allocation5 + $0x30] sm:$0xff] %v182_v21  ;;  %v111_v31 = vld [vmem:[%s670_s1 + $0x50] sm:$0xff]  ;;  %v112_v33 = vld [vmem:[%s670_s1 + $0x58] sm:$0xff] }
  0x1c   :  { %v185_v30 = vadd.f32 %v110_v28, %v35_v27  ;;  %258 = vst [vmem:[#allocation5 + $0x38] sm:$0xff] %v183_v25  ;;  %259 = vst [vmem:[#allocation5 + $0x40] sm:$0xff] %v184_v26  ;;  %v186_v34 = vadd.f32 %v111_v31, %v36_v29  ;;  %v187_v35 = vadd.f32 %v112_v33, %v37_v32  ;;  %v38_v36 = vld [vmem:[#allocation2 + $0x60] sm:$0xff]  ;;  %v39_v38 = vld [vmem:[#allocation2 + $0x68] sm:$0xff] }
  0x1d   :  { %v113_v37 = vld [vmem:[%s670_s1 + $0x60] sm:$0xff]  ;;  %v114_v40 = vld [vmem:[%s670_s1 + $0x68] sm:$0xff]  ;;  %v40_v41 = vld [vmem:[#allocation2 + $0x70] sm:$0xff] }
  0x1e   :  { %260 = vst [vmem:[#allocation5 + $0x48] sm:$0xff] %v185_v30  ;;  %v188_v39 = vadd.f32 %v113_v37, %v38_v36  ;;  %v115_v42 = vld [vmem:[%s670_s1 + $0x70] sm:$0xff]  ;;  %261 = vst [vmem:[#allocation5 + $0x50] sm:$0xff] %v186_v34  ;;  %v189_v43 = vadd.f32 %v114_v40, %v39_v38  ;;  %v41_v45 = vld [vmem:[#allocation2 + $0x78] sm:$0xff] }
  0x1f   :  { %262 = vst [vmem:[#allocation5 + $0x58] sm:$0xff] %v187_v35  ;;  %v190_v44 = vadd.f32 %v115_v42, %v40_v41  ;;  %v116_v46 = vld [vmem:[%s670_s1 + $0x78] sm:$0xff]  ;;  %v42_v47 = vld [vmem:[#allocation2 + $0x80] sm:$0xff]  ;;  %v43_v50 = vld [vmem:[#allocation2 + $0x88] sm:$0xff] }
  0x20   :  { %263 = vst [vmem:[#allocation5 + $0x60] sm:$0xff] %v188_v39  ;;  %v191_v48 = vadd.f32 %v116_v46, %v41_v45  ;;  %v117_v49 = vld [vmem:[%s670_s1 + $0x80] sm:$0xff]  ;;  %v118_v51 = vld [vmem:[%s670_s1 + $0x88] sm:$0xff]  ;;  %264 = vst [vmem:[#allocation5 + $0x68] sm:$0xff] %v189_v43 }
  0x21   :  { %265 = vst [vmem:[#allocation5 + $0x70] sm:$0xff] %v190_v44  ;;  %v192_v52 = vadd.f32 %v117_v49, %v42_v47  ;;  %v193_v53 = vadd.f32 %v118_v51, %v43_v50  ;;  %v44_v54 = vld [vmem:[#allocation2 + $0x90] sm:$0xff]  ;;  %v45_v56 = vld [vmem:[#allocation2 + $0x98] sm:$0xff]  ;;  %v46_v59 = vld [vmem:[#allocation2 + $0xa0] sm:$0xff] }
  0x22   :  { %v119_v55 = vld [vmem:[%s670_s1 + $0x90] sm:$0xff]  ;;  %266 = vst [vmem:[#allocation5 + $0x78] sm:$0xff] %v191_v48  ;;  %v120_v58 = vld [vmem:[%s670_s1 + $0x98] sm:$0xff]  ;;  %v121_v60 = vld [vmem:[%s670_s1 + $0xa0] sm:$0xff] }
  0x23   :  { %v194_v57 = vadd.f32 %v119_v55, %v44_v54  ;;  %267 = vst [vmem:[#allocation5 + $0x80] sm:$0xff] %v192_v52  ;;  %268 = vst [vmem:[#allocation5 + $0x88] sm:$0xff] %v193_v53  ;;  %v195_v61 = vadd.f32 %v120_v58, %v45_v56  ;;  %v196_v62 = vadd.f32 %v121_v60, %v46_v59  ;;  %v47_v63 = vld [vmem:[#allocation2 + $0xa8] sm:$0xff]  ;;  %v48_v1 = vld [vmem:[#allocation2 + $0xb0] sm:$0xff] }
  0x24   :  { %v122_v0 = vld [vmem:[%s670_s1 + $0xa8] sm:$0xff]  ;;  %v123_v3 = vld [vmem:[%s670_s1 + $0xb0] sm:$0xff]  ;;  %v49_v4 = vld [vmem:[#allocation2 + $0xb8] sm:$0xff] }
  0x25   :  { %269 = vst [vmem:[#allocation5 + $0x90] sm:$0xff] %v194_v57  ;;  %v197_v2 = vadd.f32 %v122_v0, %v47_v63  ;;  %v124_v5 = vld [vmem:[%s670_s1 + $0xb8] sm:$0xff]  ;;  %270 = vst [vmem:[#allocation5 + $0x98] sm:$0xff] %v195_v61  ;;  %v198_v6 = vadd.f32 %v123_v3, %v48_v1  ;;  %v50_v8 = vld [vmem:[#allocation2 + $0xc0] sm:$0xff] }
  0x26   :  { %271 = vst [vmem:[#allocation5 + $0xa0] sm:$0xff] %v196_v62  ;;  %v199_v7 = vadd.f32 %v124_v5, %v49_v4  ;;  %v125_v9 = vld [vmem:[%s670_s1 + $0xc0] sm:$0xff]  ;;  %v51_v10 = vld [vmem:[#allocation2 + $0xc8] sm:$0xff]  ;;  %v52_v13 = vld [vmem:[#allocation2 + $0xd0] sm:$0xff] }
  0x27   :  { %272 = vst [vmem:[#allocation5 + $0xa8] sm:$0xff] %v197_v2  ;;  %v200_v11 = vadd.f32 %v125_v9, %v50_v8  ;;  %v126_v12 = vld [vmem:[%s670_s1 + $0xc8] sm:$0xff]  ;;  %v127_v14 = vld [vmem:[%s670_s1 + $0xd0] sm:$0xff]  ;;  %273 = vst [vmem:[#allocation5 + $0xb0] sm:$0xff] %v198_v6 }
  0x28   :  { %274 = vst [vmem:[#allocation5 + $0xb8] sm:$0xff] %v199_v7  ;;  %v201_v15 = vadd.f32 %v126_v12, %v51_v10  ;;  %v202_v16 = vadd.f32 %v127_v14, %v52_v13  ;;  %v53_v17 = vld [vmem:[#allocation2 + $0xd8] sm:$0xff]  ;;  %v54_v19 = vld [vmem:[#allocation2 + $0xe0] sm:$0xff]  ;;  %v55_v22 = vld [vmem:[#allocation2 + $0xe8] sm:$0xff] }
  0x29   :  { %v128_v18 = vld [vmem:[%s670_s1 + $0xd8] sm:$0xff]  ;;  %275 = vst [vmem:[#allocation5 + $0xc0] sm:$0xff] %v200_v11  ;;  %v129_v21 = vld [vmem:[%s670_s1 + $0xe0] sm:$0xff]  ;;  %v130_v23 = vld [vmem:[%s670_s1 + $0xe8] sm:$0xff] }
  0x2a   :  { %v203_v20 = vadd.f32 %v128_v18, %v53_v17  ;;  %276 = vst [vmem:[#allocation5 + $0xc8] sm:$0xff] %v201_v15  ;;  %277 = vst [vmem:[#allocation5 + $0xd0] sm:$0xff] %v202_v16  ;;  %v204_v24 = vadd.f32 %v129_v21, %v54_v19  ;;  %v205_v25 = vadd.f32 %v130_v23, %v55_v22  ;;  %v56_v26 = vld [vmem:[#allocation2 + $0xf0] sm:$0xff]  ;;  %v57_v28 = vld [vmem:[#allocation2 + $0xf8] sm:$0xff] }
  0x2b   :  { %v131_v27 = vld [vmem:[%s670_s1 + $0xf0] sm:$0xff]  ;;  %v132_v30 = vld [vmem:[%s670_s1 + $0xf8] sm:$0xff]  ;;  %v58_v31 = vld [vmem:[#allocation2 + $0x100] sm:$0xff] }
  0x2c   :  { %278 = vst [vmem:[#allocation5 + $0xd8] sm:$0xff] %v203_v20  ;;  %v206_v29 = vadd.f32 %v131_v27, %v56_v26  ;;  %v133_v32 = vld [vmem:[%s670_s1 + $0x100] sm:$0xff]  ;;  %279 = vst [vmem:[#allocation5 + $0xe0] sm:$0xff] %v204_v24  ;;  %v207_v33 = vadd.f32 %v132_v30, %v57_v28  ;;  %v59_v35 = vld [vmem:[#allocation2 + $0x108] sm:$0xff] }
  0x2d   :  { %280 = vst [vmem:[#allocation5 + $0xe8] sm:$0xff] %v205_v25  ;;  %v208_v34 = vadd.f32 %v133_v32, %v58_v31  ;;  %v134_v36 = vld [vmem:[%s670_s1 + $0x108] sm:$0xff]  ;;  %v60_v37 = vld [vmem:[#allocation2 + $0x110] sm:$0xff]  ;;  %v61_v40 = vld [vmem:[#allocation2 + $0x118] sm:$0xff] }
  0x2e   :  { %281 = vst [vmem:[#allocation5 + $0xf0] sm:$0xff] %v206_v29  ;;  %v209_v38 = vadd.f32 %v134_v36, %v59_v35  ;;  %v135_v39 = vld [vmem:[%s670_s1 + $0x110] sm:$0xff]  ;;  %v136_v41 = vld [vmem:[%s670_s1 + $0x118] sm:$0xff]  ;;  %282 = vst [vmem:[#allocation5 + $0xf8] sm:$0xff] %v207_v33 }
  0x2f   :  { %283 = vst [vmem:[#allocation5 + $0x100] sm:$0xff] %v208_v34  ;;  %v210_v42 = vadd.f32 %v135_v39, %v60_v37  ;;  %v211_v43 = vadd.f32 %v136_v41, %v61_v40  ;;  %v62_v44 = vld [vmem:[#allocation2 + $0x120] sm:$0xff]  ;;  %v63_v46 = vld [vmem:[#allocation2 + $0x128] sm:$0xff]  ;;  %v64_v49 = vld [vmem:[#allocation2 + $0x130] sm:$0xff] }
  0x30   :  { %v137_v45 = vld [vmem:[%s670_s1 + $0x120] sm:$0xff]  ;;  %284 = vst [vmem:[#allocation5 + $0x108] sm:$0xff] %v209_v38  ;;  %v138_v48 = vld [vmem:[%s670_s1 + $0x128] sm:$0xff]  ;;  %v139_v50 = vld [vmem:[%s670_s1 + $0x130] sm:$0xff] }
  0x31   :  { %v212_v47 = vadd.f32 %v137_v45, %v62_v44  ;;  %285 = vst [vmem:[#allocation5 + $0x110] sm:$0xff] %v210_v42  ;;  %286 = vst [vmem:[#allocation5 + $0x118] sm:$0xff] %v211_v43  ;;  %v213_v51 = vadd.f32 %v138_v48, %v63_v46  ;;  %v214_v52 = vadd.f32 %v139_v50, %v64_v49  ;;  %v65_v53 = vld [vmem:[#allocation2 + $0x138] sm:$0xff]  ;;  %v66_v55 = vld [vmem:[#allocation2 + $0x140] sm:$0xff] }
  0x32   :  { %v140_v54 = vld [vmem:[%s670_s1 + $0x138] sm:$0xff]  ;;  %v141_v57 = vld [vmem:[%s670_s1 + $0x140] sm:$0xff]  ;;  %v67_v58 = vld [vmem:[#allocation2 + $0x148] sm:$0xff] }
  0x33   :  { %287 = vst [vmem:[#allocation5 + $0x120] sm:$0xff] %v212_v47  ;;  %v215_v56 = vadd.f32 %v140_v54, %v65_v53  ;;  %v142_v59 = vld [vmem:[%s670_s1 + $0x148] sm:$0xff]  ;;  %288 = vst [vmem:[#allocation5 + $0x128] sm:$0xff] %v213_v51  ;;  %v216_v60 = vadd.f32 %v141_v57, %v66_v55  ;;  %v68_v62 = vld [vmem:[#allocation2 + $0x150] sm:$0xff] }
  0x34   :  { %289 = vst [vmem:[#allocation5 + $0x130] sm:$0xff] %v214_v52  ;;  %v217_v61 = vadd.f32 %v142_v59, %v67_v58  ;;  %v143_v63 = vld [vmem:[%s670_s1 + $0x150] sm:$0xff]  ;;  %v69_v0 = vld [vmem:[#allocation2 + $0x158] sm:$0xff]  ;;  %v70_v3 = vld [vmem:[#allocation2 + $0x160] sm:$0xff] }
  0x35   :  { %290 = vst [vmem:[#allocation5 + $0x138] sm:$0xff] %v215_v56  ;;  %v218_v1 = vadd.f32 %v143_v63, %v68_v62  ;;  %v144_v2 = vld [vmem:[%s670_s1 + $0x158] sm:$0xff]  ;;  %v145_v4 = vld [vmem:[%s670_s1 + $0x160] sm:$0xff]  ;;  %291 = vst [vmem:[#allocation5 + $0x140] sm:$0xff] %v216_v60 }
  0x36   :  { %292 = vst [vmem:[#allocation5 + $0x148] sm:$0xff] %v217_v61  ;;  %v219_v5 = vadd.f32 %v144_v2, %v69_v0  ;;  %v220_v6 = vadd.f32 %v145_v4, %v70_v3  ;;  %v71_v7 = vld [vmem:[#allocation2 + $0x168] sm:$0xff]  ;;  %v72_v9 = vld [vmem:[#allocation2 + $0x170] sm:$0xff]  ;;  %v73_v12 = vld [vmem:[#allocation2 + $0x178] sm:$0xff] }
  0x37   :  { %v146_v8 = vld [vmem:[%s670_s1 + $0x168] sm:$0xff]  ;;  %293 = vst [vmem:[#allocation5 + $0x150] sm:$0xff] %v218_v1  ;;  %v147_v11 = vld [vmem:[%s670_s1 + $0x170] sm:$0xff]  ;;  %v148_v13 = vld [vmem:[%s670_s1 + $0x178] sm:$0xff] }
  0x38   :  { %v221_v10 = vadd.f32 %v146_v8, %v71_v7  ;;  %294 = vst [vmem:[#allocation5 + $0x158] sm:$0xff] %v219_v5  ;;  %295 = vst [vmem:[#allocation5 + $0x160] sm:$0xff] %v220_v6  ;;  %v222_v14 = vadd.f32 %v147_v11, %v72_v9  ;;  %v223_v15 = vadd.f32 %v148_v13, %v73_v12  ;;  %v74_v16 = vld [vmem:[#allocation2 + $0x180] sm:$0xff]  ;;  %v75_v18 = vld [vmem:[#allocation2 + $0x188] sm:$0xff] }
  0x39   :  { %v149_v17 = vld [vmem:[%s670_s1 + $0x180] sm:$0xff]  ;;  %v150_v20 = vld [vmem:[%s670_s1 + $0x188] sm:$0xff]  ;;  %v76_v21 = vld [vmem:[#allocation2 + $0x190] sm:$0xff] }
  0x3a   :  { %296 = vst [vmem:[#allocation5 + $0x168] sm:$0xff] %v221_v10  ;;  %v224_v19 = vadd.f32 %v149_v17, %v74_v16  ;;  %v151_v22 = vld [vmem:[%s670_s1 + $0x190] sm:$0xff]  ;;  %297 = vst [vmem:[#allocation5 + $0x170] sm:$0xff] %v222_v14  ;;  %v225_v23 = vadd.f32 %v150_v20, %v75_v18  ;;  %v77_v25 = vld [vmem:[#allocation2 + $0x198] sm:$0xff] }
  0x3b   :  { %298 = vst [vmem:[#allocation5 + $0x178] sm:$0xff] %v223_v15  ;;  %v226_v24 = vadd.f32 %v151_v22, %v76_v21  ;;  %v152_v26 = vld [vmem:[%s670_s1 + $0x198] sm:$0xff]  ;;  %v78_v27 = vld [vmem:[#allocation2 + $0x1a0] sm:$0xff]  ;;  %v79_v30 = vld [vmem:[#allocation2 + $0x1a8] sm:$0xff] }
  0x3c   :  { %299 = vst [vmem:[#allocation5 + $0x180] sm:$0xff] %v224_v19  ;;  %v227_v28 = vadd.f32 %v152_v26, %v77_v25  ;;  %v153_v29 = vld [vmem:[%s670_s1 + $0x1a0] sm:$0xff]  ;;  %v154_v31 = vld [vmem:[%s670_s1 + $0x1a8] sm:$0xff]  ;;  %300 = vst [vmem:[#allocation5 + $0x188] sm:$0xff] %v225_v23 }
  0x3d   :  { %301 = vst [vmem:[#allocation5 + $0x190] sm:$0xff] %v226_v24  ;;  %v228_v32 = vadd.f32 %v153_v29, %v78_v27  ;;  %v229_v33 = vadd.f32 %v154_v31, %v79_v30  ;;  %v80_v34 = vld [vmem:[#allocation2 + $0x1b0] sm:$0xff]  ;;  %v81_v36 = vld [vmem:[#allocation2 + $0x1b8] sm:$0xff]  ;;  %v82_v39 = vld [vmem:[#allocation2 + $0x1c0] sm:$0xff] }
  0x3e   :  { %v155_v35 = vld [vmem:[%s670_s1 + $0x1b0] sm:$0xff]  ;;  %302 = vst [vmem:[#allocation5 + $0x198] sm:$0xff] %v227_v28  ;;  %v156_v38 = vld [vmem:[%s670_s1 + $0x1b8] sm:$0xff]  ;;  %v157_v40 = vld [vmem:[%s670_s1 + $0x1c0] sm:$0xff] }
  0x3f   :  { %v230_v37 = vadd.f32 %v155_v35, %v80_v34  ;;  %303 = vst [vmem:[#allocation5 + $0x1a0] sm:$0xff] %v228_v32  ;;  %304 = vst [vmem:[#allocation5 + $0x1a8] sm:$0xff] %v229_v33  ;;  %v231_v41 = vadd.f32 %v156_v38, %v81_v36  ;;  %v232_v42 = vadd.f32 %v157_v40, %v82_v39  ;;  %v83_v43 = vld [vmem:[#allocation2 + $0x1c8] sm:$0xff]  ;;  %v84_v45 = vld [vmem:[#allocation2 + $0x1d0] sm:$0xff] }
  0x40   :  { %v158_v44 = vld [vmem:[%s670_s1 + $0x1c8] sm:$0xff]  ;;  %v159_v47 = vld [vmem:[%s670_s1 + $0x1d0] sm:$0xff]  ;;  %v85_v48 = vld [vmem:[#allocation2 + $0x1d8] sm:$0xff] }
  0x41   :  { %305 = vst [vmem:[#allocation5 + $0x1b0] sm:$0xff] %v230_v37  ;;  %v233_v46 = vadd.f32 %v158_v44, %v83_v43  ;;  %v160_v49 = vld [vmem:[%s670_s1 + $0x1d8] sm:$0xff]  ;;  %306 = vst [vmem:[#allocation5 + $0x1b8] sm:$0xff] %v231_v41  ;;  %v234_v50 = vadd.f32 %v159_v47, %v84_v45  ;;  %v86_v52 = vld [vmem:[#allocation2 + $0x1e0] sm:$0xff] }
  0x42   :  { %307 = vst [vmem:[#allocation5 + $0x1c0] sm:$0xff] %v232_v42  ;;  %v235_v51 = vadd.f32 %v160_v49, %v85_v48  ;;  %v161_v53 = vld [vmem:[%s670_s1 + $0x1e0] sm:$0xff]  ;;  %v87_v54 = vld [vmem:[#allocation2 + $0x1e8] sm:$0xff]  ;;  %v88_v57 = vld [vmem:[#allocation2 + $0x1f0] sm:$0xff] }
  0x43   :  { %308 = vst [vmem:[#allocation5 + $0x1c8] sm:$0xff] %v233_v46  ;;  %v236_v55 = vadd.f32 %v161_v53, %v86_v52  ;;  %v162_v56 = vld [vmem:[%s670_s1 + $0x1e8] sm:$0xff]  ;;  %v163_v58 = vld [vmem:[%s670_s1 + $0x1f0] sm:$0xff]  ;;  %309 = vst [vmem:[#allocation5 + $0x1d0] sm:$0xff] %v234_v50 }
  0x44   :  { %310 = vst [vmem:[#allocation5 + $0x1d8] sm:$0xff] %v235_v51  ;;  %v237_v59 = vadd.f32 %v162_v56, %v87_v54  ;;  %v238_v60 = vadd.f32 %v163_v58, %v88_v57  ;;  %v89_v61 = vld [vmem:[#allocation2 + $0x1f8] sm:$0xff]  ;;  %v90_v63 = vld [vmem:[#allocation2 + $0x200] sm:$0xff]  ;;  %v91_v2 = vld [vmem:[#allocation2 + $0x208] sm:$0xff] }
  0x45   :  { %v164_v62 = vld [vmem:[%s670_s1 + $0x1f8] sm:$0xff]  ;;  %311 = vst [vmem:[#allocation5 + $0x1e0] sm:$0xff] %v236_v55  ;;  %v165_v1 = vld [vmem:[%s670_s1 + $0x200] sm:$0xff]  ;;  %v166_v3 = vld [vmem:[%s670_s1 + $0x208] sm:$0xff] }
  0x46   :  { %v239_v0 = vadd.f32 %v164_v62, %v89_v61  ;;  %312 = vst [vmem:[#allocation5 + $0x1e8] sm:$0xff] %v237_v59  ;;  %313 = vst [vmem:[#allocation5 + $0x1f0] sm:$0xff] %v238_v60  ;;  %v240_v4 = vadd.f32 %v165_v1, %v90_v63  ;;  %v241_v5 = vadd.f32 %v166_v3, %v91_v2  ;;  %v92_v6 = vld [vmem:[#allocation2 + $0x210] sm:$0xff]  ;;  %v93_v8 = vld [vmem:[#allocation2 + $0x218] sm:$0xff] }
  0x47   :  { %v167_v7 = vld [vmem:[%s670_s1 + $0x210] sm:$0xff]  ;;  %v168_v10 = vld [vmem:[%s670_s1 + $0x218] sm:$0xff]  ;;  %v94_v11 = vld [vmem:[#allocation2 + $0x220] sm:$0xff] }
  0x48   :  { %314 = vst [vmem:[#allocation5 + $0x1f8] sm:$0xff] %v239_v0  ;;  %v242_v9 = vadd.f32 %v167_v7, %v92_v6  ;;  %v169_v12 = vld [vmem:[%s670_s1 + $0x220] sm:$0xff]  ;;  %315 = vst [vmem:[#allocation5 + $0x200] sm:$0xff] %v240_v4  ;;  %v243_v13 = vadd.f32 %v168_v10, %v93_v8  ;;  %v95_v15 = vld [vmem:[#allocation2 + $0x228] sm:$0xff] }
  0x49   :  { %316 = vst [vmem:[#allocation5 + $0x208] sm:$0xff] %v241_v5  ;;  %v244_v14 = vadd.f32 %v169_v12, %v94_v11  ;;  %v170_v16 = vld [vmem:[%s670_s1 + $0x228] sm:$0xff]  ;;  %v96_v17 = vld [vmem:[#allocation2 + $0x230] sm:$0xff]  ;;  %v97_v20 = vld [vmem:[#allocation2 + $0x238] sm:$0xff] }
  0x4a   :  { %317 = vst [vmem:[#allocation5 + $0x210] sm:$0xff] %v242_v9  ;;  %v245_v18 = vadd.f32 %v170_v16, %v95_v15  ;;  %v171_v19 = vld [vmem:[%s670_s1 + $0x230] sm:$0xff]  ;;  %v172_v21 = vld [vmem:[%s670_s1 + $0x238] sm:$0xff]  ;;  %318 = vst [vmem:[#allocation5 + $0x218] sm:$0xff] %v243_v13 }
  0x4b   :  { %319 = vst [vmem:[#allocation5 + $0x220] sm:$0xff] %v244_v14  ;;  %v246_v22 = vadd.f32 %v171_v19, %v96_v17  ;;  %v247_v23 = vadd.f32 %v172_v21, %v97_v20  ;;  %v98_v24 = vld [vmem:[#allocation2 + $0x240] sm:$0xf]  ;;  %v99_v26 = vld [vmem:[#allocation2 + $0x248] sm:$0xf] }
  0x4c   :  { %v173_v25 = vld [vmem:[%s670_s1 + $0x240] sm:$0xf]  ;;  %320 = vst [vmem:[#allocation5 + $0x228] sm:$0xff] %v245_v18  ;;  %v174_v28 = vld [vmem:[%s670_s1 + $0x248] sm:$0xf] }
  0x4d   :  { %v248_v27 = vadd.f32 %v173_v25, %v98_v24  ;;  %v100_v29 = vld [vmem:[#allocation2 + $0x250] sm:$0xf]  ;;  %321 = vst [vmem:[#allocation5 + $0x230] sm:$0xff] %v246_v22  ;;  %322 = vst [vmem:[#allocation5 + $0x238] sm:$0xff] %v247_v23  ;;  %v249_v31 = vadd.f32 %v174_v28, %v99_v26 }
  0x4e   :  { %v175_v30 = vld [vmem:[%s670_s1 + $0x250] sm:$0xf] }
  0x4f   :  { %v250_v32 = vadd.f32 %v175_v30, %v100_v29  ;;  %323 = vst [vmem:[#allocation5 + $0x240] sm:$0xf] %v248_v27  ;;  %324 = vst [vmem:[#allocation5 + $0x248] sm:$0xf] %v249_v31 }
  0x51   :  { %325 = vst [vmem:[#allocation5 + $0x250] sm:$0xf] %v250_v32 }
  0x52   :  { %380 = shalt.err (!%p377_p12)
}
  0x53   :  { %s381_s14 = scalar_lea.hbm %s671_s2, 9600 }
  0x54   :  { %p382_p13 = scmp.ne.s32.totalorder %s671_s2, %s381_s14  ;;  %p385_p0 = scmp.lt.u32.totalorder %s381_s14, %s671_s2 }
  0x56   :  { %p387_p1 = pnand %p385_p0, %p382_p13 }
  0x58   :  { %390 = shalt.err (!%p387_p1)
}
  0x59   :  { %337 = dma.vmem_to_hbm [thread:$0]  %s332_s4, 9600, %s671_s2, [#allocation4], %s396_s19, %s396_s19, %s397_s20  }
  0x5a   :  { %393 = dma.done.wait [#allocation4], 9600  }
  0x5b   :  { %394 = vsyncadd [#allocation4], 4294957696 }
  0x5c   :  { %341 = vsyncpa [#allocation3], 1 }
  0x5d   :  { %342 = vsyncpa [#allocation4], 1 }

</bundles_post_ra>
